<compile_context>
chip_gen: v7x
topology: tpu7x:2x2x1
jax: 0.10.0
libtpu: 0.0.40
codegen_flags: <defaults>
</compile_context>

<pallas_src>
import jax
import jax.numpy as jnp
from jax.experimental import pallas as pl
from jax.experimental.pallas import tpu as pltpu


def _round_up(x, m):
    return ((x + m - 1) // m) * m


def mlp_kernel(x_ref,
               w0_ref, b0_ref, w1_ref, b1_ref, w2_ref, b2_ref, w3_ref, b3_ref,
               a0_ref, a1_ref, a2_ref, a3_ref):
    """Fused 4-layer MLP:
       a0 = x W0 + b0
       a1 = relu(a0) W1 + b1
       a2 = relu(a1) W2 + b2
       a3 = relu(a2) W3 + b3
    All operands are 128-padded; stores are lane-dense."""
    x = x_ref[...]

    a0 = jnp.dot(x, w0_ref[...], preferred_element_type=jnp.float32) + b0_ref[...]
    a0_ref[...] = a0.astype(a0_ref.dtype)

    h0 = jnp.maximum(a0, 0.0)
    a1 = jnp.dot(h0, w1_ref[...], preferred_element_type=jnp.float32) + b1_ref[...]
    a1_ref[...] = a1.astype(a1_ref.dtype)

    h1 = jnp.maximum(a1, 0.0)
    a2 = jnp.dot(h1, w2_ref[...], preferred_element_type=jnp.float32) + b2_ref[...]
    a2_ref[...] = a2.astype(a2_ref.dtype)

    h2 = jnp.maximum(a2, 0.0)
    a3 = jnp.dot(h2, w3_ref[...], preferred_element_type=jnp.float32) + b3_ref[...]
    a3_ref[...] = a3.astype(a3_ref.dtype)


def prepare_params(params, architecture):
    """One-time prep: transpose torch-layout weights to [in, out] and zero-pad
    every dimension up to a multiple of 128.  Do this once, outside the hot
    path (per perf review)."""
    dims = tuple(architecture)                      # (d0, d1, d2, d3, d4)
    dimsp = tuple(_round_up(d, 128) for d in dims)  # padded dims

    def pad_w(w, in_p, out_p):
        wt = jnp.asarray(w, jnp.float32).T          # [in, out]
        out = jnp.zeros((in_p, out_p), jnp.float32)
        return out.at[: wt.shape[0], : wt.shape[1]].set(wt)

    def pad_b(b, out_p):
        b = jnp.asarray(b, jnp.float32)
        out = jnp.zeros((1, out_p), jnp.float32)
        return out.at[0, : b.shape[0]].set(b)

    prep = {"dims": dims, "dimsp": dimsp}
    for i in range(4):
        prep[f"w{i}"] = pad_w(params[f"w{i}"], dimsp[i], dimsp[i + 1])
        prep[f"b{i}"] = pad_b(params[f"b{i}"], dimsp[i + 1])
    return prep


def deeper_neural_network(x, prep):
    """Runs the fused MLP kernel.

    x:    [N, C, H, W] (or already-flat [N, d0]) float32
    prep: output of prepare_params (pre-transposed, 128-padded weights).
    Returns (activity_0, activity_1, activity_2, activity_3) exactly as the
    torch module (unpadded shapes)."""
    d0, d1, d2, d3, d4 = prep["dims"]
    d0p, d1p, d2p, d3p, d4p = prep["dimsp"]

    n = x.shape[0]
    x_flat = jnp.reshape(x, (n, -1)).astype(jnp.float32)   # nn.Flatten()

    # Batch tile: >=8 (sublane), capped so (x tile + outputs + weights) x 2
    # buffers stays comfortably inside v7x's 64 MiB VMEM budget.
    tb = 512 if n >= 512 else _round_up(n, 8)
    n_pad = _round_up(n, tb)

    # Pad input: zero batch rows + zero feature lanes (numerically exact).
    x_p = jnp.zeros((n_pad, d0p), jnp.float32).at[:n, :d0].set(x_flat)

    grid = (n_pad // tb,)

    row_spec = lambda dp: pl.BlockSpec((tb, dp), lambda i: (i, 0))      # batch-tiled
    full_spec = lambda shape: pl.BlockSpec(shape, lambda i: (0, 0))     # resident

    a0p, a1p, a2p, a3p = pl.pallas_call(
        mlp_kernel,
        out_shape=(
            jax.ShapeDtypeStruct((n_pad, d1p), jnp.float32),
            jax.ShapeDtypeStruct((n_pad, d2p), jnp.float32),
            jax.ShapeDtypeStruct((n_pad, d3p), jnp.float32),
            jax.ShapeDtypeStruct((n_pad, d4p), jnp.float32),
        ),
        grid=grid,
        in_specs=[
            row_spec(d0p),
            full_spec((d0p, d1p)), full_spec((1, d1p)),
            full_spec((d1p, d2p)), full_spec((1, d2p)),
            full_spec((d2p, d3p)), full_spec((1, d3p)),
            full_spec((d3p, d4p)), full_spec((1, d4p)),
        ],
        out_specs=(
            row_spec(d1p),
            row_spec(d2p),
            row_spec(d3p),
            row_spec(d4p),
        ),
        compiler_params=pltpu.CompilerParams(
            dimension_semantics=("parallel",),   # shard batch tiles across TCs (v7x)
            vmem_limit_bytes=32 * 1024 * 1024,
        ),
    )(x_p, prep["w0"], prep["b0"], prep["w1"], prep["b1"],
      prep["w2"], prep["b2"], prep["w3"], prep["b3"])

    # Slice away the zero padding (cheap XLA glue).
    return (a0p[:n, :d1], a1p[:n, :d2], a2p[:n, :d3], a3p[:n, :d4])


def init_params(key, architecture):
    """Deterministic synthetic init matching torch.nn.Linear shapes
    (w_i: [out, in], b_i: [out])."""
    ks = jax.random.split(key, 8)

    def unif(k, shape, fan_in):
        bound = 1.0 / jnp.sqrt(fan_in)
        return jax.random.uniform(k, shape, jnp.float32, -bound, bound)

    params = {}
    for i in range(4):
        din, dout = architecture[i], architecture[i + 1]
        params[f"w{i}"] = unif(ks[2 * i], (dout, din), din)
        params[f"b{i}"] = unif(ks[2 * i + 1], (dout,), din)
    return params


if __name__ == "__main__":
    # architecture = [64, 32, 32, 16, 8]; input [N,C,H,W] = [8,4,4,4] -> flatten to 64
    architecture = (64, 32, 32, 16, 8)
    key = jax.random.PRNGKey(0)
    kx, kp = jax.random.split(key)

    x = jax.random.normal(kx, (8, 4, 4, 4), jnp.float32)
    params = init_params(kp, architecture)

    prep = prepare_params(params, architecture)          # one-time, off hot path
    a0, a1, a2, a3 = deeper_neural_network(x, prep)
    jax.block_until_ready((a0, a1, a2, a3))

    # Reference check in plain JAX (same math as the torch module).
    xf = x.reshape(x.shape[0], -1)
    r0 = xf @ params["w0"].T + params["b0"]
    r1 = jnp.maximum(r0, 0.0) @ params["w1"].T + params["b1"]
    r2 = jnp.maximum(r1, 0.0) @ params["w2"].T + params["b2"]
    r3 = jnp.maximum(r2, 0.0) @ params["w3"].T + params["b3"]
    assert a0.shape == r0.shape and jnp.allclose(a0, r0, atol=1e-5), "activity_0 mismatch"
    assert a1.shape == r1.shape and jnp.allclose(a1, r1, atol=1e-5), "activity_1 mismatch"
    assert a2.shape == r2.shape and jnp.allclose(a2, r2, atol=1e-5), "activity_2 mismatch"
    assert a3.shape == r3.shape and jnp.allclose(a3, r3, atol=1e-5), "activity_3 mismatch"

    print("KERNEL_OK")
</pallas_src>

<mosaic_0001>
module attributes {stable_mosaic.version = 11 : i64} {
  func.func @mlp_kernel(%arg0: i32, %arg1: memref<8x128xf32, #tpu.memory_space<vmem>>, %arg2: memref<128x128xf32, #tpu.memory_space<vmem>>, %arg3: memref<1x128xf32, #tpu.memory_space<vmem>>, %arg4: memref<128x128xf32, #tpu.memory_space<vmem>>, %arg5: memref<1x128xf32, #tpu.memory_space<vmem>>, %arg6: memref<128x128xf32, #tpu.memory_space<vmem>>, %arg7: memref<1x128xf32, #tpu.memory_space<vmem>>, %arg8: memref<128x128xf32, #tpu.memory_space<vmem>>, %arg9: memref<1x128xf32, #tpu.memory_space<vmem>>, %arg10: memref<8x128xf32, #tpu.memory_space<vmem>>, %arg11: memref<8x128xf32, #tpu.memory_space<vmem>>, %arg12: memref<8x128xf32, #tpu.memory_space<vmem>>, %arg13: memref<8x128xf32, #tpu.memory_space<vmem>>) attributes {dimension_semantics = [#tpu.dimension_semantics<parallel>], iteration_bounds = array<i64: 1>, scalar_prefetch = 0 : i64, scratch_operands = 0 : i64, tpu.core_type = #tpu.core_type<tc>, window_params = [{transform_indices = @transform_0, window_bounds = array<i64: 8, 128>}, {pipeline_mode = #tpu.pipeline_mode<synchronous>, transform_indices = @transform_1, window_bounds = array<i64: 128, 128>}, {pipeline_mode = #tpu.pipeline_mode<synchronous>, transform_indices = @transform_2, window_bounds = array<i64: 1, 128>}, {pipeline_mode = #tpu.pipeline_mode<synchronous>, transform_indices = @transform_3, window_bounds = array<i64: 128, 128>}, {pipeline_mode = #tpu.pipeline_mode<synchronous>, transform_indices = @transform_4, window_bounds = array<i64: 1, 128>}, {pipeline_mode = #tpu.pipeline_mode<synchronous>, transform_indices = @transform_5, window_bounds = array<i64: 128, 128>}, {pipeline_mode = #tpu.pipeline_mode<synchronous>, transform_indices = @transform_6, window_bounds = array<i64: 1, 128>}, {pipeline_mode = #tpu.pipeline_mode<synchronous>, transform_indices = @transform_7, window_bounds = array<i64: 128, 128>}, {pipeline_mode = #tpu.pipeline_mode<synchronous>, transform_indices = @transform_8, window_bounds = array<i64: 1, 128>}, {transform_indices = @transform_9, window_bounds = array<i64: 8, 128>}, {transform_indices = @transform_10, window_bounds = array<i64: 8, 128>}, {transform_indices = @transform_11, window_bounds = array<i64: 8, 128>}, {transform_indices = @transform_12, window_bounds = array<i64: 8, 128>}]} {
    %c0 = arith.constant 0 : index
    %c0_0 = arith.constant 0 : index
    %0 = vector.load %arg1[%c0, %c0_0] : memref<8x128xf32, #tpu.memory_space<vmem>>, vector<8x128xf32>
    %c0_1 = arith.constant 0 : index
    %c0_2 = arith.constant 0 : index
    %1 = vector.load %arg2[%c0_1, %c0_2] : memref<128x128xf32, #tpu.memory_space<vmem>>, vector<128x128xf32>
    %cst = arith.constant dense<0.000000e+00> : vector<8x128xf32>
    %2 = tpu.matmul %0, %1, %cst {dimension_numbers = #tpu.dot_dimension_numbers<[1], [0], [0], [1], [0, 0, 1, 1], [], []>} : vector<8x128xf32>, vector<128x128xf32>, vector<8x128xf32> -> vector<8x128xf32>
    %c0_3 = arith.constant 0 : index
    %c0_4 = arith.constant 0 : index
    %3 = vector.load %arg3[%c0_3, %c0_4] : memref<1x128xf32, #tpu.memory_space<vmem>>, vector<1x128xf32>
    %4 = vector.broadcast %3 : vector<1x128xf32> to vector<8x128xf32>
    %5 = arith.addf %2, %4 : vector<8x128xf32>
    %c0_5 = arith.constant 0 : index
    %c0_6 = arith.constant 0 : index
    %6 = vector.load %arg10[%c0_5, %c0_6] : memref<8x128xf32, #tpu.memory_space<vmem>>, vector<8x128xf32>
    tpu.vector_store %arg10[%c0_5, %c0_6], %5 {strides = array<i32>} : memref<8x128xf32, #tpu.memory_space<vmem>>, vector<8x128xf32>,
    %cst_7 = arith.constant 0.000000e+00 : f32
    %7 = vector.broadcast %cst_7 : f32 to vector<8x128xf32>
    %8 = arith.maximumf %5, %7 : vector<8x128xf32>
    %c0_8 = arith.constant 0 : index
    %c0_9 = arith.constant 0 : index
    %9 = vector.load %arg4[%c0_8, %c0_9] : memref<128x128xf32, #tpu.memory_space<vmem>>, vector<128x128xf32>
    %cst_10 = arith.constant dense<0.000000e+00> : vector<8x128xf32>
    %10 = tpu.matmul %8, %9, %cst_10 {dimension_numbers = #tpu.dot_dimension_numbers<[1], [0], [0], [1], [0, 0, 1, 1], [], []>} : vector<8x128xf32>, vector<128x128xf32>, vector<8x128xf32> -> vector<8x128xf32>
    %c0_11 = arith.constant 0 : index
    %c0_12 = arith.constant 0 : index
    %11 = vector.load %arg5[%c0_11, %c0_12] : memref<1x128xf32, #tpu.memory_space<vmem>>, vector<1x128xf32>
    %12 = vector.broadcast %11 : vector<1x128xf32> to vector<8x128xf32>
    %13 = arith.addf %10, %12 : vector<8x128xf32>
    %c0_13 = arith.constant 0 : index
    %c0_14 = arith.constant 0 : index
    %14 = vector.load %arg11[%c0_13, %c0_14] : memref<8x128xf32, #tpu.memory_space<vmem>>, vector<8x128xf32>
    tpu.vector_store %arg11[%c0_13, %c0_14], %13 {strides = array<i32>} : memref<8x128xf32, #tpu.memory_space<vmem>>, vector<8x128xf32>,
    %cst_15 = arith.constant 0.000000e+00 : f32
    %15 = vector.broadcast %cst_15 : f32 to vector<8x128xf32>
    %16 = arith.maximumf %13, %15 : vector<8x128xf32>
    %c0_16 = arith.constant 0 : index
    %c0_17 = arith.constant 0 : index
    %17 = vector.load %arg6[%c0_16, %c0_17] : memref<128x128xf32, #tpu.memory_space<vmem>>, vector<128x128xf32>
    %cst_18 = arith.constant dense<0.000000e+00> : vector<8x128xf32>
    %18 = tpu.matmul %16, %17, %cst_18 {dimension_numbers = #tpu.dot_dimension_numbers<[1], [0], [0], [1], [0, 0, 1, 1], [], []>} : vector<8x128xf32>, vector<128x128xf32>, vector<8x128xf32> -> vector<8x128xf32>
    %c0_19 = arith.constant 0 : index
    %c0_20 = arith.constant 0 : index
    %19 = vector.load %arg7[%c0_19, %c0_20] : memref<1x128xf32, #tpu.memory_space<vmem>>, vector<1x128xf32>
    %20 = vector.broadcast %19 : vector<1x128xf32> to vector<8x128xf32>
    %21 = arith.addf %18, %20 : vector<8x128xf32>
    %c0_21 = arith.constant 0 : index
    %c0_22 = arith.constant 0 : index
    %22 = vector.load %arg12[%c0_21, %c0_22] : memref<8x128xf32, #tpu.memory_space<vmem>>, vector<8x128xf32>
    tpu.vector_store %arg12[%c0_21, %c0_22], %21 {strides = array<i32>} : memref<8x128xf32, #tpu.memory_space<vmem>>, vector<8x128xf32>,
    %cst_23 = arith.constant 0.000000e+00 : f32
    %23 = vector.broadcast %cst_23 : f32 to vector<8x128xf32>
    %24 = arith.maximumf %21, %23 : vector<8x128xf32>
    %c0_24 = arith.constant 0 : index
    %c0_25 = arith.constant 0 : index
    %25 = vector.load %arg8[%c0_24, %c0_25] : memref<128x128xf32, #tpu.memory_space<vmem>>, vector<128x128xf32>
    %cst_26 = arith.constant dense<0.000000e+00> : vector<8x128xf32>
    %26 = tpu.matmul %24, %25, %cst_26 {dimension_numbers = #tpu.dot_dimension_numbers<[1], [0], [0], [1], [0, 0, 1, 1], [], []>} : vector<8x128xf32>, vector<128x128xf32>, vector<8x128xf32> -> vector<8x128xf32>
    %c0_27 = arith.constant 0 : index
    %c0_28 = arith.constant 0 : index
    %27 = vector.load %arg9[%c0_27, %c0_28] : memref<1x128xf32, #tpu.memory_space<vmem>>, vector<1x128xf32>
    %28 = vector.broadcast %27 : vector<1x128xf32> to vector<8x128xf32>
    %29 = arith.addf %26, %28 : vector<8x128xf32>
    %c0_29 = arith.constant 0 : index
    %c0_30 = arith.constant 0 : index
    %30 = vector.load %arg13[%c0_29, %c0_30] : memref<8x128xf32, #tpu.memory_space<vmem>>, vector<8x128xf32>
    tpu.vector_store %arg13[%c0_29, %c0_30], %29 {strides = array<i32>} : memref<8x128xf32, #tpu.memory_space<vmem>>, vector<8x128xf32>,
    return
  }
  func.func @transform_0(%arg0: i32) -> (i32, i32) {
    %c0_i32 = arith.constant 0 : i32
    %c0_i32_0 = arith.constant 0 : i32
    return %arg0, %c0_i32 : i32, i32
  }
  func.func @transform_1(%arg0: i32) -> (i32, i32) {
    %c0_i32 = arith.constant 0 : i32
    %c0_i32_0 = arith.constant 0 : i32
    %c0_i32_1 = arith.constant 0 : i32
    return %c0_i32, %c0_i32_0 : i32, i32
  }
  func.func @transform_2(%arg0: i32) -> (i32, i32) {
    %c0_i32 = arith.constant 0 : i32
    %c0_i32_0 = arith.constant 0 : i32
    %c0_i32_1 = arith.constant 0 : i32
    return %c0_i32, %c0_i32_0 : i32, i32
  }
  func.func @transform_3(%arg0: i32) -> (i32, i32) {
    %c0_i32 = arith.constant 0 : i32
    %c0_i32_0 = arith.constant 0 : i32
    %c0_i32_1 = arith.constant 0 : i32
    return %c0_i32, %c0_i32_0 : i32, i32
  }
  func.func @transform_4(%arg0: i32) -> (i32, i32) {
    %c0_i32 = arith.constant 0 : i32
    %c0_i32_0 = arith.constant 0 : i32
    %c0_i32_1 = arith.constant 0 : i32
    return %c0_i32, %c0_i32_0 : i32, i32
  }
  func.func @transform_5(%arg0: i32) -> (i32, i32) {
    %c0_i32 = arith.constant 0 : i32
    %c0_i32_0 = arith.constant 0 : i32
    %c0_i32_1 = arith.constant 0 : i32
    return %c0_i32, %c0_i32_0 : i32, i32
  }
  func.func @transform_6(%arg0: i32) -> (i32, i32) {
    %c0_i32 = arith.constant 0 : i32
    %c0_i32_0 = arith.constant 0 : i32
    %c0_i32_1 = arith.constant 0 : i32
    return %c0_i32, %c0_i32_0 : i32, i32
  }
  func.func @transform_7(%arg0: i32) -> (i32, i32) {
    %c0_i32 = arith.constant 0 : i32
    %c0_i32_0 = arith.constant 0 : i32
    %c0_i32_1 = arith.constant 0 : i32
    return %c0_i32, %c0_i32_0 : i32, i32
  }
  func.func @transform_8(%arg0: i32) -> (i32, i32) {
    %c0_i32 = arith.constant 0 : i32
    %c0_i32_0 = arith.constant 0 : i32
    %c0_i32_1 = arith.constant 0 : i32
    return %c0_i32, %c0_i32_0 : i32, i32
  }
  func.func @transform_9(%arg0: i32) -> (i32, i32) {
    %c0_i32 = arith.constant 0 : i32
    %c0_i32_0 = arith.constant 0 : i32
    return %arg0, %c0_i32 : i32, i32
  }
  func.func @transform_10(%arg0: i32) -> (i32, i32) {
    %c0_i32 = arith.constant 0 : i32
    %c0_i32_0 = arith.constant 0 : i32
    return %arg0, %c0_i32 : i32, i32
  }
  func.func @transform_11(%arg0: i32) -> (i32, i32) {
    %c0_i32 = arith.constant 0 : i32
    %c0_i32_0 = arith.constant 0 : i32
    return %arg0, %c0_i32 : i32, i32
  }
  func.func @transform_12(%arg0: i32) -> (i32, i32) {
    %c0_i32 = arith.constant 0 : i32
    %c0_i32_0 = arith.constant 0 : i32
    return %arg0, %c0_i32 : i32, i32
  }
}

</mosaic_0001>

<bundles_post_ra>
// kernel: tpu_custom_call.1
= control target key start
LH: loop header
LB: loop body
LE: loop exit
PB: predicated region body
PF: predicated region fallthrough
CT: control target
= control target key end

     0   :  { %18 = vsyncpa [#allocation3], 0  ;;  %s1326_s0 = inlined_call_operand.hbm [shape: f32[8,128], index: 0, kind: input, shape index: {}]   ;;  %s1327_s1 = inlined_call_operand.hbm [shape: f32[128,128], index: 1, kind: input, shape index: {}]   ;;  %s1328_s2 = inlined_call_operand.vmem [shape: f32[1,128], index: 2, kind: input, shape index: {}]   ;;  %s1329_s3 = inlined_call_operand.hbm [shape: f32[128,128], index: 3, kind: input, shape index: {}]   ;;  %s1330_s4 = inlined_call_operand.vmem [shape: f32[1,128], index: 4, kind: input, shape index: {}]   ;;  %s1331_s5 = inlined_call_operand.hbm [shape: f32[128,128], index: 5, kind: input, shape index: {}]   ;;  %s1332_s6 = inlined_call_operand.vmem [shape: f32[1,128], index: 6, kind: input, shape index: {}]   ;;  %s1333_s7 = inlined_call_operand.hbm [shape: f32[128,128], index: 7, kind: input, shape index: {}]   ;;  %s1334_s8 = inlined_call_operand.vmem [shape: f32[1,128], index: 8, kind: input, shape index: {}]   ;;  %s1335_s9 = inlined_call_operand.hbm [shape: f32[8,128], index: 9, kind: output, shape index: {0}]   ;;  %s1336_s10 = inlined_call_operand.hbm [shape: f32[8,128], index: 10, kind: output, shape index: {1}]   ;;  %s1337_s11 = inlined_call_operand.hbm [shape: f32[8,128], index: 11, kind: output, shape index: {2}]   ;;  %s1338_s12 = inlined_call_operand.hbm [shape: f32[8,128], index: 12, kind: output, shape index: {3}]  }
   0x1   :  { %19 = vsyncpa [#allocation6], 0 }
   0x2   :  { %20 = vsyncpa [#allocation9], 0 }
   0x3   :  { %21 = vsyncpa [#allocation4], 0 }
   0x4   :  { %22 = vsyncpa [#allocation13], 0 }
   0x5   :  { %23 = vsyncpa [#allocation16], 0  ;;  %s1075_s21 = smov [#allocation5]   ;;  %s865_s25 = scalar_lea.hbm %s1327_s1, 2048 }
   0x6   :  { %s39_s22 = sshll.u32 %s1075_s21, 4  ;;  %p866_p0 = scmp.ne.s32.totalorder %s1327_s1, %s865_s25  ;;  %s40_s22 = int_to_ptr.vmem [resolvable:$true] %s39_s22 }
   0x7   :  { %p869_p1 = scmp.lt.u32.totalorder %s865_s25, %s1327_s1 }
   0x9   :  { %p871_p2 = pnand %p869_p1, %p866_p0 }
   0xb   :  { %874 = shalt.err (!%p871_p2)
}
   0xc   :  { %s875_s30 = scalar_lea.vmem %s40_s22, 2048  ;;  %p880_p4 = scmp.lt.s32.totalorder %s40_s22, %s40_s22 }
   0xd   :  { %p876_p3 = scmp.ne.s32.totalorder %s40_s22, %s875_s30  ;;  %p881_p5 = scmp.lt.s32.totalorder %s875_s30, %s875_s30 }
   0xf   :  { %p882_p6 = por %p881_p5, %p880_p4 }
  0x11   :  { %p883_p7 = pnand %p882_p6, %p876_p3 }
  0x13   :  { %886 = shalt.err (!%p883_p7)
}
  0x14   :  { %s1076_s13 = smov 128   ;;  %s1077_s14 = smov 8  }
  0x15   :  { %45 = dma.hbm_to_vmem [thread:$0]  %s1327_s1, 2048, %s40_s22, [#allocation6], %s1076_s13, %s1076_s13, %s1077_s14  }
  0x16   :  { %s1078_s17 = smov [#allocation8]   ;;  %s1079_s19 = smov [#allocation2]  }
  0x17   :  { %s67_s18 = sshll.u32 %s1078_s17, 4  ;;  %s30_s20 = sshll.u32 %s1079_s19, 4  ;;  %s68_s18 = int_to_ptr.vmem [resolvable:$true] %s67_s18  ;;  %s31_s20 = int_to_ptr.vmem [resolvable:$true] %s30_s20 }
  0x18   :  { %s887_s24 = scalar_lea.hbm %s1331_s5, 2048 }
  0x19   :  { %p888_p8 = scmp.ne.s32.totalorder %s1331_s5, %s887_s24  ;;  %p891_p9 = scmp.lt.u32.totalorder %s887_s24, %s1331_s5 }
  0x1b   :  { %p893_p10 = pnand %p891_p9, %p888_p8 }
  0x1d   :  { %896 = shalt.err (!%p893_p10)
}
  0x1e   :  { %s897_s1 = scalar_lea.vmem %s68_s18, 2048  ;;  %p902_p12 = scmp.lt.s32.totalorder %s68_s18, %s68_s18 }
  0x1f   :  { %p898_p11 = scmp.ne.s32.totalorder %s68_s18, %s897_s1  ;;  %p903_p13 = scmp.lt.s32.totalorder %s897_s1, %s897_s1 }
  0x21   :  { %p904_p0 = por %p903_p13, %p902_p12 }
  0x23   :  { %p905_p1 = pnand %p904_p0, %p898_p11 }
  0x25   :  { %908 = shalt.err (!%p905_p1)
}
  0x26   :  { %73 = dma.hbm_to_vmem [thread:$0]  %s1331_s5, 2048, %s68_s18, [#allocation9], %s1076_s13, %s1076_s13, %s1077_s14  }
  0x27   :  { %s909_s16 = scalar_lea.hbm %s1326_s0, 128 }
  0x28   :  { %p910_p2 = scmp.ne.s32.totalorder %s1326_s0, %s909_s16  ;;  %p913_p3 = scmp.lt.u32.totalorder %s909_s16, %s1326_s0 }
  0x2a   :  { %p915_p4 = pnand %p913_p3, %p910_p2 }
  0x2c   :  { %918 = shalt.err (!%p915_p4)
}
  0x2d   :  { %s919_s24 = scalar_lea.vmem %s31_s20, 128  ;;  %p924_p6 = scmp.lt.s32.totalorder %s31_s20, %s31_s20 }
  0x2e   :  { %p920_p5 = scmp.ne.s32.totalorder %s31_s20, %s919_s24  ;;  %p925_p7 = scmp.lt.s32.totalorder %s919_s24, %s919_s24 }
  0x30   :  { %p926_p8 = por %p925_p7, %p924_p6 }
  0x32   :  { %p927_p9 = pnand %p926_p8, %p920_p5 }
  0x34   :  { %930 = shalt.err (!%p927_p9)
}
  0x35   :  { %33 = dma.hbm_to_vmem [thread:$0]  %s1326_s0, 128, %s31_s20, [#allocation3]  }
  0x36   :  { %s1080_s25 = smov [#allocation7]   ;;  %s1081_s27 = smov [#allocation10]  }
  0x37   :  { %s53_s26 = sshll.u32 %s1080_s25, 4  ;;  %s81_s28 = sshll.u32 %s1081_s27, 4  ;;  %s54_s26 = int_to_ptr.vmem [resolvable:$true] %s53_s26  ;;  %s82_s28 = int_to_ptr.vmem [resolvable:$true] %s81_s28 }
  0x38   :  { %s931_s29 = scalar_lea.hbm %s1329_s3, 2048 }
  0x39   :  { %p932_p10 = scmp.ne.s32.totalorder %s1329_s3, %s931_s29  ;;  %p935_p11 = scmp.lt.u32.totalorder %s931_s29, %s1329_s3 }
  0x3b   :  { %p937_p12 = pnand %p935_p11, %p932_p10 }
  0x3d   :  { %940 = shalt.err (!%p937_p12)
}
  0x3e   :  { %s941_s0 = scalar_lea.vmem %s54_s26, 2048  ;;  %p946_p0 = scmp.lt.s32.totalorder %s54_s26, %s54_s26 }
  0x3f   :  { %p942_p13 = scmp.ne.s32.totalorder %s54_s26, %s941_s0  ;;  %p947_p1 = scmp.lt.s32.totalorder %s941_s0, %s941_s0 }
  0x41   :  { %p948_p2 = por %p947_p1, %p946_p0 }
  0x43   :  { %p949_p3 = pnand %p948_p2, %p942_p13 }
  0x45   :  { %952 = shalt.err (!%p949_p3)
}
  0x46   :  { %59 = dma.hbm_to_vmem [thread:$0]  %s1329_s3, 2048, %s54_s26, [#allocation6], %s1076_s13, %s1076_s13, %s1077_s14  }
  0x47   :  { %s953_s24 = scalar_lea.hbm %s1333_s7, 2048 }
  0x48   :  { %p954_p4 = scmp.ne.s32.totalorder %s1333_s7, %s953_s24  ;;  %p957_p5 = scmp.lt.u32.totalorder %s953_s24, %s1333_s7 }
  0x4a   :  { %p959_p6 = pnand %p957_p5, %p954_p4 }
  0x4c   :  { %962 = shalt.err (!%p959_p6)
}
  0x4d   :  { %s963_s1 = scalar_lea.vmem %s82_s28, 2048  ;;  %p968_p8 = scmp.lt.s32.totalorder %s82_s28, %s82_s28 }
  0x4e   :  { %p964_p7 = scmp.ne.s32.totalorder %s82_s28, %s963_s1  ;;  %p969_p9 = scmp.lt.s32.totalorder %s963_s1, %s963_s1 }
  0x50   :  { %p970_p10 = por %p969_p9, %p968_p8 }
  0x52   :  { %p971_p11 = pnand %p970_p10, %p964_p7 }
  0x54   :  { %974 = shalt.err (!%p971_p11)
}
  0x55   :  { %87 = dma.hbm_to_vmem [thread:$0]  %s1333_s7, 2048, %s82_s28, [#allocation9], %s1076_s13, %s1076_s13, %s1077_s14  }
  0x56   :  { %1063 = dma.done.wait [#allocation3], 128  }
  0x57   :  { %1064 = vsyncadd [#allocation3], 4294967168 }
  0x58   :  { %1065 = dma.done.wait [#allocation6], 4096  }
  0x59   :  { %1066 = vsyncadd [#allocation6], 4294963200 }
  0x5a   :  { %1067 = dma.done.wait [#allocation9], 4096  }
  0x5b   :  { %1068 = vsyncadd [#allocation9], 4294963200  ;;  %v1082_v0 = vmov 0.0|0.0   ;;  %vm1083_vm0 = vmmov 0   ;;  %v1084_v1 = vmov 0.0   ;;  %v106_v2 = vld [vmem:[#allocation5] sm:$0xff] }
  0x5c   :  { %755 = vmatprep.subr.bf16.mxu0 %v1082_v0  ;;  %647 = vmatprep.mubr.msk.f32.mxu0 %vm1083_vm0, %v1084_v1  ;;  %v107_v3 = vld [vmem:[#allocation5 + $0x8] sm:$0xff]  ;;  %v108_v4 = vld [vmem:[#allocation5 + $0x10] sm:$0xff]  ;;  %v109_v6 = vld [vmem:[#allocation5 + $0x18] sm:$0xff]  ;;  %s1086_s30 = smov [#allocation11]  }
  0x5d   :  { %779 = vmatprep.subr.bf16.mxu1 %v1082_v0  ;;  %682 = vmatprep.mubr.msk.f32.mxu1 %vm1083_vm0, %v1084_v1  ;;  %v756_v5 = vpack.c.bf16 %v107_v3, %v106_v2  ;;  %v759_v7 = vpack.c.bf16 %v109_v6, %v108_v4  ;;  %v110_v8 = vld [vmem:[#allocation5 + $0x20] sm:$0xff]  ;;  %v111_v9 = vld [vmem:[#allocation5 + $0x28] sm:$0xff]  ;;  %v203_v12 = vld [vmem:[#allocation7 + $0x10] sm:$0xff]  ;;  %s491_s15 = sshll.u32 %s1086_s30, 4  ;;  %s492_s15 = int_to_ptr.vmem [resolvable:$true] %s491_s15 }
  0x5e   :  { %v201_v10 = vld [vmem:[#allocation7] sm:$0xff]  ;;  %v202_v11 = vld [vmem:[#allocation7 + $0x8] sm:$0xff]  ;;  %v204_v13 = vld [vmem:[#allocation7 + $0x18] sm:$0xff]  ;;  %v762_v14 = vpack.c.bf16 %v111_v9, %v110_v8 }
  0x5f   :  { %757 = vmatpush3.bf16.msra.mxu0 %v756_v5  ;;  %v780_v15 = vpack.c.bf16 %v202_v11, %v201_v10  ;;  %v112_v16 = vld [vmem:[#allocation5 + $0x30] sm:$0xff]  ;;  %v113_v17 = vld [vmem:[#allocation5 + $0x38] sm:$0xff]  ;;  %v783_v18 = vpack.c.bf16 %v204_v13, %v203_v12  ;;  %v205_v19 = vld [vmem:[#allocation7 + $0x20] sm:$0xff] }
  0x60   :  { %758 = vmatprep.subr.bf16.mxu0 %v1082_v0  ;;  %v206_v20 = vld [vmem:[#allocation7 + $0x28] sm:$0xff]  ;;  %v765_v21 = vpack.c.bf16 %v113_v17, %v112_v16  ;;  %v114_v22 = vld [vmem:[#allocation5 + $0x40] sm:$0xff]  ;;  %v207_v25 = vld [vmem:[#allocation7 + $0x30] sm:$0xff] }
  0x61   :  { %781 = vmatpush3.bf16.msra.mxu1 %v780_v15  ;;  %v115_v23 = vld [vmem:[#allocation5 + $0x48] sm:$0xff]  ;;  %v786_v24 = vpack.c.bf16 %v206_v20, %v205_v19  ;;  %v208_v26 = vld [vmem:[#allocation7 + $0x38] sm:$0xff]  ;;  %v116_v28 = vld [vmem:[#allocation5 + $0x50] sm:$0xff] }
  0x62   :  { %782 = vmatprep.subr.bf16.mxu1 %v1082_v0  ;;  %v768_v27 = vpack.c.bf16 %v115_v23, %v114_v22  ;;  %v117_v29 = vld [vmem:[#allocation5 + $0x58] sm:$0xff]  ;;  %v789_v30 = vpack.c.bf16 %v208_v26, %v207_v25  ;;  %v209_v31 = vld [vmem:[#allocation7 + $0x40] sm:$0xff]  ;;  %v210_v32 = vld [vmem:[#allocation7 + $0x48] sm:$0xff] }
  0x63   :  { %760 = vmatpush3.bf16.msra.mxu0 %v759_v7  ;;  %v771_v33 = vpack.c.bf16 %v117_v29, %v116_v28  ;;  %v118_v34 = vld [vmem:[#allocation5 + $0x60] sm:$0xff]  ;;  %v119_v35 = vld [vmem:[#allocation5 + $0x68] sm:$0xff]  ;;  %v792_v36 = vpack.c.bf16 %v210_v32, %v209_v31  ;;  %v211_v37 = vld [vmem:[#allocation7 + $0x50] sm:$0xff] }
  0x64   :  { %761 = vmatprep.subr.bf16.mxu0 %v1082_v0  ;;  %v212_v38 = vld [vmem:[#allocation7 + $0x58] sm:$0xff]  ;;  %v774_v39 = vpack.c.bf16 %v119_v35, %v118_v34  ;;  %v120_v40 = vld [vmem:[#allocation5 + $0x70] sm:$0xff]  ;;  %v213_v43 = vld [vmem:[#allocation7 + $0x60] sm:$0xff] }
  0x65   :  { %784 = vmatpush3.bf16.msra.mxu1 %v783_v18  ;;  %v121_v41 = vld [vmem:[#allocation5 + $0x78] sm:$0xff]  ;;  %v795_v42 = vpack.c.bf16 %v212_v38, %v211_v37  ;;  %v214_v44 = vld [vmem:[#allocation7 + $0x68] sm:$0xff]  ;;  %v215_v48 = vld [vmem:[#allocation7 + $0x70] sm:$0xff] }
  0x66   :  { %785 = vmatprep.subr.bf16.mxu1 %v1082_v0  ;;  %v777_v45 = vpack.c.bf16 %v121_v41, %v120_v40  ;;  %v798_v46 = vpack.c.bf16 %v214_v44, %v213_v43  ;;  %v105_v47 = vld [vmem:[#allocation2] sm:$0xff]  ;;  %v296_v51 = vld [vmem:[#allocation8] sm:$0xff]  ;;  %v297_v52 = vld [vmem:[#allocation8 + $0x8] sm:$0xff] }
  0x67   :  { %763 = vmatpush3.bf16.msra.mxu0 %v762_v14  ;;  %v216_v49 = vld [vmem:[#allocation7 + $0x78] sm:$0xff]  ;;  %v298_v53 = vld [vmem:[#allocation8 + $0x10] sm:$0xff]  ;;  %v804_v54 = vpack.c.bf16 %v297_v52, %v296_v51  ;;  %v300_v57 = vld [vmem:[#allocation8 + $0x20] sm:$0xff] }
  0x68   :  { %764 = vmatprep.subr.bf16.mxu0 %v1082_v0  ;;  %v801_v50 = vpack.c.bf16 %v216_v49, %v215_v48  ;;  %v299_v55 = vld [vmem:[#allocation8 + $0x18] sm:$0xff]  ;;  %v301_v58 = vld [vmem:[#allocation8 + $0x28] sm:$0xff]  ;;  %v302_v60 = vld [vmem:[#allocation8 + $0x30] sm:$0xff] }
  0x69   :  { %787 = vmatpush3.bf16.msra.mxu1 %v786_v24  ;;  %v807_v56 = vpack.c.bf16 %v299_v55, %v298_v53  ;;  %v810_v59 = vpack.c.bf16 %v301_v58, %v300_v57  ;;  %v303_v61 = vld [vmem:[#allocation8 + $0x38] sm:$0xff]  ;;  %v304_v63 = vld [vmem:[#allocation8 + $0x40] sm:$0xff]  ;;  %v305_v2 = vld [vmem:[#allocation8 + $0x48] sm:$0xff] }
  0x6a   :  { %788 = vmatprep.subr.bf16.mxu1 %v1082_v0  ;;  %v813_v62 = vpack.c.bf16 %v303_v61, %v302_v60  ;;  %v816_v3 = vpack.c.bf16 %v305_v2, %v304_v63  ;;  %v306_v4 = vld [vmem:[#allocation8 + $0x50] sm:$0xff]  ;;  %v307_v5 = vld [vmem:[#allocation8 + $0x58] sm:$0xff]  ;;  %v308_v7 = vld [vmem:[#allocation8 + $0x60] sm:$0xff] }
  0x6b   :  { %766 = vmatpush3.bf16.msra.mxu0 %v765_v21  ;;  %v819_v6 = vpack.c.bf16 %v307_v5, %v306_v4  ;;  %v309_v8 = vld [vmem:[#allocation8 + $0x68] sm:$0xff]  ;;  %v543_v10 = vld [vmem:[%s1328_s2] ss:$0 sm:$0xff]  ;;  %v310_v15 = vld [vmem:[#allocation8 + $0x70] sm:$0xff] }
  0x6c   :  { %767 = vmatprep.subr.bf16.mxu0 %v1082_v0  ;;  %v822_v9 = vpack.c.bf16 %v309_v8, %v308_v7  ;;  %v311_v16 = vld [vmem:[#allocation8 + $0x78] sm:$0xff]  ;;  %v391_v18 = vld [vmem:[#allocation10] sm:$0xff]  ;;  %v392_v19 = vld [vmem:[#allocation10 + $0x8] sm:$0xff] }
  0x6d   :  { %790 = vmatpush3.bf16.msra.mxu1 %v789_v30  ;;  %v825_v17 = vpack.c.bf16 %v311_v16, %v310_v15  ;;  %v393_v20 = vld [vmem:[#allocation10 + $0x10] sm:$0xff]  ;;  %v828_v21 = vpack.c.bf16 %v392_v19, %v391_v18  ;;  %v394_v22 = vld [vmem:[#allocation10 + $0x18] sm:$0xff]  ;;  %v395_v24 = vld [vmem:[#allocation10 + $0x20] sm:$0xff] }
  0x6e   :  { %791 = vmatprep.subr.bf16.mxu1 %v1082_v0  ;;  %v831_v23 = vpack.c.bf16 %v394_v22, %v393_v20  ;;  %v396_v25 = vld [vmem:[#allocation10 + $0x28] sm:$0xff]  ;;  %v399_v29 = vld [vmem:[#allocation10 + $0x40] sm:$0xff]  ;;  %v401_v32 = vld [vmem:[#allocation10 + $0x50] sm:$0xff] }
  0x6f   :  { %769 = vmatpush3.bf16.msra.mxu0 %v768_v27  ;;  %v834_v26 = vpack.c.bf16 %v396_v25, %v395_v24  ;;  %v398_v27 = vld [vmem:[#allocation10 + $0x38] sm:$0xff]  ;;  %v400_v30 = vld [vmem:[#allocation10 + $0x48] sm:$0xff]  ;;  %v403_v35 = vld [vmem:[#allocation10 + $0x60] sm:$0xff] }
  0x70   :  { %770 = vmatprep.subr.bf16.mxu0 %v1082_v0  ;;  %v840_v31 = vpack.c.bf16 %v400_v30, %v399_v29  ;;  %v544_v38 = vld [vmem:[%s1330_s4] ss:$0 sm:$0xff]  ;;  %v405_v43 = vld [vmem:[#allocation10 + $0x70] sm:$0xff]  ;;  %s1085_s4 = smov [#allocation12]  }
  0x71   :  { %793 = vmatpush3.bf16.msra.mxu1 %v792_v36  ;;  %v404_v36 = vld [vmem:[#allocation10 + $0x68] sm:$0xff]  ;;  %v406_v44 = vld [vmem:[#allocation10 + $0x78] sm:$0xff]  ;;  %s501_s29 = sshll.u32 %s1085_s4, 4  ;;  %s502_s29 = int_to_ptr.vmem [resolvable:$true] %s501_s29 }
  0x72   :  { %794 = vmatprep.subr.bf16.mxu1 %v1082_v0  ;;  %v846_v37 = vpack.c.bf16 %v404_v36, %v403_v35  ;;  %s975_s16 = scalar_lea.vmem %s502_s29, 128  ;;  %p980_p13 = scmp.lt.s32.totalorder %s502_s29, %s502_s29 }
  0x73   :  { %772 = vmatpush3.bf16.msra.mxu0 %v771_v33  ;;  %v402_v33 = vld [vmem:[#allocation10 + $0x58] sm:$0xff]  ;;  %p976_p12 = scmp.ne.s32.totalorder %s502_s29, %s975_s16  ;;  %p981_p0 = scmp.lt.s32.totalorder %s975_s16, %s975_s16 }
  0x74   :  { %773 = vmatprep.subr.bf16.mxu0 %v1082_v0  ;;  %v843_v34 = vpack.c.bf16 %v402_v33, %v401_v32 }
  0x75   :  { %796 = vmatpush3.bf16.msra.mxu1 %v795_v42  ;;  %p982_p1 = por %p981_p0, %p980_p13 }
  0x76   :  { %797 = vmatprep.subr.bf16.mxu1 %v1082_v0 }
  0x77   :  { %775 = vmatpush3.bf16.msra.mxu0 %v774_v39  ;;  %p983_p2 = pnand %p982_p1, %p976_p12 }
  0x78   :  { %776 = vmatprep.subr.bf16.mxu0 %v1082_v0 }
  0x79   :  { %799 = vmatpush3.bf16.msra.mxu1 %v798_v46  ;;  %v545_v46 = vld [vmem:[%s1332_s6] ss:$0 sm:$0xff] }
  0x7a   :  { %800 = vmatprep.subr.bf16.mxu1 %v1082_v0 }
  0x7b   :  { %778 = vmatpush3.bf16.msra.mxu0 %v777_v45  ;;  %v849_v45 = vpack.c.bf16 %v406_v44, %v405_v43 }
  0x7c   :  { %803 = vmatprep.subr.bf16.mxu0 %v1082_v0 }
  0x7d   :  { %802 = vmatpush3.bf16.msra.mxu1 %v801_v50 }
  0x7e   :  { %648 = vmatmul.mubr.f32.vlgmr.msra.gmra.mrb[0].mxu0 %v105_v47  ;;  %827 = vmatprep.subr.bf16.mxu1 %v1082_v0 }
  0x7f   :  { %717 = vmatprep.mubr.msk.f32.mxu0 %vm1083_vm0, %v1084_v1  ;;  %805 = vmatpush3.bf16.msra.mxu0 %v804_v54 }
  0x80   :  { %806 = vmatprep.subr.bf16.mxu0 %v1082_v0 }
  0x83   :  { %808 = vmatpush3.bf16.msra.mxu0 %v807_v56 }
  0x84   :  { %809 = vmatprep.subr.bf16.mxu0 %v1082_v0 }
  0x87   :  { %811 = vmatpush3.bf16.msra.mxu0 %v810_v59 }
  0x88   :  { %812 = vmatprep.subr.bf16.mxu0 %v1082_v0 }
  0x8b   :  { %814 = vmatpush3.bf16.msra.mxu0 %v813_v62 }
  0x8c   :  { %815 = vmatprep.subr.bf16.mxu0 %v1082_v0 }
  0x8f   :  { %817 = vmatpush3.bf16.msra.mxu0 %v816_v3 }
  0x90   :  { %818 = vmatprep.subr.bf16.mxu0 %v1082_v0 }
  0x93   :  { %820 = vmatpush3.bf16.msra.mxu0 %v819_v6 }
  0x94   :  { %821 = vmatprep.subr.bf16.mxu0 %v1082_v0 }
  0x97   :  { %823 = vmatpush3.bf16.msra.mxu0 %v822_v9 }
  0x98   :  { %824 = vmatprep.subr.bf16.mxu0 %v1082_v0 }
  0x9b   :  { %826 = vmatpush3.bf16.msra.mxu0 %v825_v17 }
 0x151   :  { %v195_v11 = vpop.f32.mrb[0].mxu0 }
 0x152   :  { %v196_v12 = vadd.f32 %v543_v10, %v195_v11  ;;  %v649_v13 = vpop.f32.mrb[1].mxu0 }
 0x154   :  { %v200_v14 = vmax.f32 %v196_v12, 0.0  ;;  %199 = vst [vmem:[#allocation11] sm:$0xff] %v196_v12 }
 0x156   :  { %683 = vmatmul.mubr.f32.vlgmr.msra.gmra.mrb[0].mxu1 %v200_v14 }
 0x157   :  { %752 = vmatprep.mubr.msk.f32.mxu1 %vm1083_vm0, %v1084_v1  ;;  %829 = vmatpush3.bf16.msra.mxu1 %v828_v21  ;;  %v397_v1 = vld [vmem:[#allocation10 + $0x30] sm:$0xff] }
 0x158   :  { %830 = vmatprep.subr.bf16.mxu1 %v1082_v0  ;;  %v837_v28 = vpack.c.bf16 %v398_v27, %v397_v1 }
 0x15b   :  { %832 = vmatpush3.bf16.msra.mxu1 %v831_v23 }
 0x15c   :  { %833 = vmatprep.subr.bf16.mxu1 %v1082_v0 }
 0x15f   :  { %835 = vmatpush3.bf16.msra.mxu1 %v834_v26 }
 0x160   :  { %836 = vmatprep.subr.bf16.mxu1 %v1082_v0 }
 0x163   :  { %838 = vmatpush3.bf16.msra.mxu1 %v837_v28 }
 0x164   :  { %839 = vmatprep.subr.bf16.mxu1 %v1082_v0 }
 0x167   :  { %841 = vmatpush3.bf16.msra.mxu1 %v840_v31 }
 0x168   :  { %842 = vmatprep.subr.bf16.mxu1 %v1082_v0 }
 0x16b   :  { %844 = vmatpush3.bf16.msra.mxu1 %v843_v34 }
 0x16c   :  { %845 = vmatprep.subr.bf16.mxu1 %v1082_v0 }
 0x16f   :  { %847 = vmatpush3.bf16.msra.mxu1 %v846_v37 }
 0x170   :  { %848 = vmatprep.subr.bf16.mxu1 %v1082_v0 }
 0x173   :  { %850 = vmatpush3.bf16.msra.mxu1 %v849_v45 }
 0x229   :  { %v290_v39 = vpop.f32.mrb[0].mxu1 }
 0x22a   :  { %v291_v40 = vadd.f32 %v544_v38, %v290_v39  ;;  %v684_v41 = vpop.f32.mrb[1].mxu1 }
 0x22c   :  { %v295_v42 = vmax.f32 %v291_v40, 0.0  ;;  %294 = vst [vmem:[#allocation12] sm:$0xff] %v291_v40 }
 0x22e   :  { %718 = vmatmul.mubr.f32.vlgmr.msra.gmra.mrb[2].mxu0 %v295_v42 }
 0x301   :  { %v385_v47 = vpop.f32.mrb[2].mxu0 }
 0x302   :  { %v386_v0 = vadd.f32 %v545_v46, %v385_v47  ;;  %v719_v48 = vpop.f32.mrb[3].mxu0 }
 0x304   :  { %389 = vst [vmem:[#allocation14] sm:$0xff] %v386_v0  ;;  %v390_v49 = vmax.f32 %v386_v0, 0.0 }
 0x306   :  { %753 = vmatmul.mubr.f32.vlgmr.msra.gmra.mrb[2].mxu1 %v390_v49 }
 0x307   :  { %986 = shalt.err (!%p983_p2)
}
 0x308   :  { %s987_s0 = scalar_lea.hbm %s1336_s10, 128 }
 0x309   :  { %p988_p3 = scmp.ne.s32.totalorder %s1336_s10, %s987_s0  ;;  %p991_p4 = scmp.lt.u32.totalorder %s987_s0, %s1336_s10 }
 0x30b   :  { %p993_p5 = pnand %p991_p4, %p988_p3 }
 0x30d   :  { %996 = shalt.err (!%p993_p5)
}
 0x30e   :  { %504 = dma.vmem_to_hbm [thread:$0]  %s502_s29, 128, %s1336_s10, [#allocation13]  }
 0x30f   :  { %s997_s18 = scalar_lea.vmem %s492_s15, 128  ;;  %p1002_p7 = scmp.lt.s32.totalorder %s492_s15, %s492_s15 }
 0x310   :  { %p998_p6 = scmp.ne.s32.totalorder %s492_s15, %s997_s18  ;;  %p1003_p8 = scmp.lt.s32.totalorder %s997_s18, %s997_s18 }
 0x312   :  { %p1004_p9 = por %p1003_p8, %p1002_p7 }
 0x314   :  { %p1005_p10 = pnand %p1004_p9, %p998_p6 }
 0x316   :  { %1008 = shalt.err (!%p1005_p10)
}
 0x317   :  { %s1009_s1 = scalar_lea.hbm %s1335_s9, 128 }
 0x318   :  { %p1010_p11 = scmp.ne.s32.totalorder %s1335_s9, %s1009_s1  ;;  %p1013_p12 = scmp.lt.u32.totalorder %s1009_s1, %s1335_s9 }
 0x31a   :  { %p1015_p13 = pnand %p1013_p12, %p1010_p11 }
 0x31c   :  { %1018 = shalt.err (!%p1015_p13)
}
 0x31d   :  { %494 = dma.vmem_to_hbm [thread:$0]  %s492_s15, 128, %s1335_s9, [#allocation4]  }
 0x31e   :  { %s1087_s14 = smov [#allocation14]  }
 0x31f   :  { %s511_s28 = sshll.u32 %s1087_s14, 4  ;;  %s512_s28 = int_to_ptr.vmem [resolvable:$true] %s511_s28 }
 0x320   :  { %s1019_s22 = scalar_lea.vmem %s512_s28, 128  ;;  %p1024_p1 = scmp.lt.s32.totalorder %s512_s28, %s512_s28 }
 0x321   :  { %p1020_p0 = scmp.ne.s32.totalorder %s512_s28, %s1019_s22  ;;  %p1025_p2 = scmp.lt.s32.totalorder %s1019_s22, %s1019_s22 }
 0x323   :  { %p1026_p3 = por %p1025_p2, %p1024_p1 }
 0x325   :  { %p1027_p4 = pnand %p1026_p3, %p1020_p0 }
 0x327   :  { %1030 = shalt.err (!%p1027_p4)
}
 0x328   :  { %s1031_s30 = scalar_lea.hbm %s1337_s11, 128 }
 0x329   :  { %p1032_p5 = scmp.ne.s32.totalorder %s1337_s11, %s1031_s30  ;;  %p1035_p6 = scmp.lt.u32.totalorder %s1031_s30, %s1337_s11 }
 0x32b   :  { %p1037_p7 = pnand %p1035_p6, %p1032_p5 }
 0x32d   :  { %1040 = shalt.err (!%p1037_p7)
}
 0x32e   :  { %514 = dma.vmem_to_hbm [thread:$0]  %s512_s28, 128, %s1337_s11, [#allocation13]   ;;  %v546_v50 = vld [vmem:[%s1334_s8] ss:$0 sm:$0xff] }
 0x32f   :  { %s1088_s21 = smov [#allocation15]  }
 0x330   :  { %s521_s23 = sshll.u32 %s1088_s21, 4  ;;  %s522_s23 = int_to_ptr.vmem [resolvable:$true] %s521_s23 }
 0x331   :  { %s1041_s24 = scalar_lea.vmem %s522_s23, 128  ;;  %p1046_p9 = scmp.lt.s32.totalorder %s522_s23, %s522_s23 }
 0x332   :  { %p1042_p8 = scmp.ne.s32.totalorder %s522_s23, %s1041_s24  ;;  %p1047_p10 = scmp.lt.s32.totalorder %s1041_s24, %s1041_s24 }
 0x334   :  { %p1048_p11 = por %p1047_p10, %p1046_p9 }
 0x336   :  { %p1049_p12 = pnand %p1048_p11, %p1042_p8 }
 0x3d9   :  { %v480_v51 = vpop.f32.mrb[2].mxu1 }
 0x3da   :  { %v481_v52 = vadd.f32 %v546_v50, %v480_v51  ;;  %v754_v53 = vpop.f32.mrb[3].mxu1 }
 0x3dc   :  { %484 = vst [vmem:[#allocation15] sm:$0xff] %v481_v52 }
 0x3dd   :  { %1052 = shalt.err (!%p1049_p12)
}
 0x3de   :  { %s1053_s18 = scalar_lea.hbm %s1338_s12, 128 }
 0x3df   :  { %p1054_p13 = scmp.ne.s32.totalorder %s1338_s12, %s1053_s18  ;;  %p1057_p0 = scmp.lt.u32.totalorder %s1053_s18, %s1338_s12 }
 0x3e1   :  { %p1059_p1 = pnand %p1057_p0, %p1054_p13 }
 0x3e3   :  { %1062 = shalt.err (!%p1059_p1)
}
 0x3e4   :  { %524 = dma.vmem_to_hbm [thread:$0]  %s522_s23, 128, %s1338_s12, [#allocation16]  }
 0x3e5   :  { %1069 = dma.done.wait [#allocation4], 128  }
 0x3e6   :  { %1070 = vsyncadd [#allocation4], 4294967168 }
 0x3e7   :  { %1071 = dma.done.wait [#allocation13], 256  }
 0x3e8   :  { %1072 = vsyncadd [#allocation13], 4294967040 }
 0x3e9   :  { %1073 = dma.done.wait [#allocation16], 128  }
 0x3ea   :  { %1074 = vsyncadd [#allocation16], 4294967168 }
 0x3eb   :  { %537 = vsyncpa [#allocation3], 1 }
 0x3ec   :  { %538 = vsyncpa [#allocation6], 1 }
 0x3ed   :  { %539 = vsyncpa [#allocation9], 1 }
 0x3ee   :  { %540 = vsyncpa [#allocation4], 1 }
 0x3ef   :  { %541 = vsyncpa [#allocation13], 1 }
 0x3f0   :  { %542 = vsyncpa [#allocation16], 1 }

</bundles_post_ra>
